<compile_context>
chip_gen: v5e
topology: v5e:2x2
jax: 0.10.0
libtpu: 0.0.40
codegen_flags: <defaults>
</compile_context>

<pallas_src>
import math

import jax
import jax.numpy as jnp
from jax.experimental import pallas as pl
from jax.experimental.pallas import tpu as pltpu


def _final_layer_kernel(x_ref, w_ref, b_ref, o_ref, acc_ref):
    """Grid = (token_tiles, k_tiles).

    x_ref : (T, tk)            input activation tile
    w_ref : (tk, vocab_size)   transposed weight tile (lane-dense over vocab)
    b_ref : (1, vocab_size)    bias (resident across the grid)
    o_ref : (T, vocab_size)    softmax output tile
    acc_ref: (T, vocab_size)   f32 logit accumulator (VMEM scratch)
    """
    k = pl.program_id(1)

    @pl.when(k == 0)
    def _():
        acc_ref[...] = jnp.zeros_like(acc_ref)

    # MXU matmul, f32 accumulation.
    acc_ref[...] += jnp.dot(x_ref[...], w_ref[...],
                            preferred_element_type=jnp.float32)

    @pl.when(k == pl.num_programs(1) - 1)
    def _():
        logits = acc_ref[...] + b_ref[...]                  # (T, V)
        m = jnp.max(logits, axis=-1, keepdims=True)
        e = jnp.exp(logits - m)
        denom = jnp.sum(e, axis=-1, keepdims=True)
        o_ref[...] = (e / denom).astype(o_ref.dtype)


def final_layer(x, weight, bias, *, tok_tile=128):
    """x: (batch, seq, dim_model) f32
       weight: (vocab_size, dim_model) f32   (PyTorch nn.Linear layout)
       bias:   (vocab_size,) f32
       returns softmax(x @ weight.T + bias, axis=-1): (batch, seq, vocab_size)
    """
    batch, seq, dim_model = x.shape
    vocab_size = weight.shape[0]
    n_tok = batch * seq

    # Token tile: multiple of 8 (sublane-dense), capped at tok_tile.
    T = min(tok_tile, max(8, ((n_tok + 7) // 8) * 8))
    n_tok_pad = ((n_tok + T - 1) // T) * T

    # K tile: multiple of 128 when possible; otherwise take the whole dim.
    tk = 512 if (dim_model % 512 == 0) else dim_model
    num_k = dim_model // tk

    x2 = x.reshape(n_tok, dim_model)
    if n_tok_pad != n_tok:
        x2 = jnp.pad(x2, ((0, n_tok_pad - n_tok), (0, 0)))

    w_t = weight.T                     # (dim_model, vocab_size) — vocab on lanes
    b2 = bias.reshape(1, vocab_size)

    # TODO(synk): for very large vocab_size (tile > VMEM budget, esp. v7x's
    # 64 MiB), a vocab-tiled online-softmax variant would be needed.
    out = pl.pallas_call(
        _final_layer_kernel,
        out_shape=jax.ShapeDtypeStruct((n_tok_pad, vocab_size), x.dtype),
        grid_spec=pltpu.PrefetchScalarGridSpec(
            num_scalar_prefetch=0,
            grid=(n_tok_pad // T, num_k),
            in_specs=[
                pl.BlockSpec((T, tk), lambda i, k: (i, k)),
                pl.BlockSpec((tk, vocab_size), lambda i, k: (k, 0)),
                pl.BlockSpec((1, vocab_size), lambda i, k: (0, 0)),
            ],
            out_specs=pl.BlockSpec((T, vocab_size), lambda i, k: (i, 0)),
            scratch_shapes=[pltpu.VMEM((T, vocab_size), jnp.float32)],
        ),
        compiler_params=pltpu.CompilerParams(
            dimension_semantics=("parallel", "arbitrary")),
    )(x2, w_t, b2)

    if n_tok_pad != n_tok:
        out = out[:n_tok]
    return out.reshape(batch, seq, vocab_size)


if __name__ == "__main__":
    # Small deterministic setup consistent with finalLayer(dim_model, vocab_size).
    dim_model = 128
    vocab_size = 256
    batch, seq = 2, 8

    key = jax.random.PRNGKey(0)
    k_x, k_w, k_b = jax.random.split(key, 3)

    # nn.Linear default init: U(-1/sqrt(in_features), 1/sqrt(in_features))
    bound = 1.0 / math.sqrt(dim_model)
    weight = jax.random.uniform(k_w, (vocab_size, dim_model), jnp.float32,
                                -bound, bound)
    bias = jax.random.uniform(k_b, (vocab_size,), jnp.float32, -bound, bound)
    x = jax.random.normal(k_x, (batch, seq, dim_model), dtype=jnp.float32)

    out = final_layer(x, weight, bias)
    out = jax.block_until_ready(out)

    # Pure-JAX reference.
    ref = jax.nn.softmax(jnp.einsum("bsd,vd->bsv", x, weight) + bias, axis=-1)

    assert out.shape == (batch, seq, vocab_size)
    assert out.dtype == jnp.float32
    assert jnp.allclose(out, ref, atol=2e-4, rtol=2e-3), \
        float(jnp.max(jnp.abs(out - ref)))

    print("KERNEL_OK")
</pallas_src>

<mosaic_0001>
module attributes {stable_mosaic.version = 11 : i64} {
  func.func @_final_layer_kernel(%arg0: i32, %arg1: i32, %arg2: memref<16x128xf32, #tpu.memory_space<vmem>>, %arg3: memref<128x256xf32, #tpu.memory_space<vmem>>, %arg4: memref<1x256xf32, #tpu.memory_space<vmem>>, %arg5: memref<16x256xf32, #tpu.memory_space<vmem>>, %arg6: memref<16x256xf32, #tpu.memory_space<vmem>>) attributes {dimension_semantics = [#tpu.dimension_semantics<parallel>, #tpu.dimension_semantics<arbitrary>], iteration_bounds = array<i64: 1, 1>, scalar_prefetch = 0 : i64, scratch_operands = 1 : i64, tpu.core_type = #tpu.core_type<tc>, window_params = [{transform_indices = @transform_0, window_bounds = array<i64: 16, 128>}, {transform_indices = @transform_1, window_bounds = array<i64: 128, 256>}, {pipeline_mode = #tpu.pipeline_mode<synchronous>, transform_indices = @transform_2, window_bounds = array<i64: 1, 256>}, {transform_indices = @transform_3, window_bounds = array<i64: 16, 256>}]} {
    %c0_i32 = arith.constant 0 : i32
    %0 = arith.cmpi eq, %arg1, %c0_i32 : i32
    %1 = arith.extui %0 : i1 to i32
    %c0_i32_0 = arith.constant 0 : i32
    %2 = arith.cmpi ne, %1, %c0_i32_0 : i32
    scf.if %2 {
      %cst_10 = arith.constant 0.000000e+00 : f32
      %12 = vector.broadcast %cst_10 : f32 to vector<16x256xf32>
      %c0_11 = arith.constant 0 : index
      %c0_12 = arith.constant 0 : index
      %13 = vector.load %arg6[%c0_11, %c0_12] : memref<16x256xf32, #tpu.memory_space<vmem>>, vector<16x256xf32>
      tpu.vector_store %arg6[%c0_11, %c0_12], %12 {strides = array<i32>} : memref<16x256xf32, #tpu.memory_space<vmem>>, vector<16x256xf32>,
    } else {
    }
    %c0 = arith.constant 0 : index
    %c0_1 = arith.constant 0 : index
    %3 = vector.load %arg6[%c0, %c0_1] : memref<16x256xf32, #tpu.memory_space<vmem>>, vector<16x256xf32>
    %c0_2 = arith.constant 0 : index
    %c0_3 = arith.constant 0 : index
    %4 = vector.load %arg2[%c0_2, %c0_3] : memref<16x128xf32, #tpu.memory_space<vmem>>, vector<16x128xf32>
    %c0_4 = arith.constant 0 : index
    %c0_5 = arith.constant 0 : index
    %5 = vector.load %arg3[%c0_4, %c0_5] : memref<128x256xf32, #tpu.memory_space<vmem>>, vector<128x256xf32>
    %cst = arith.constant dense<0.000000e+00> : vector<16x256xf32>
    %6 = tpu.matmul %4, %5, %cst {dimension_numbers = #tpu.dot_dimension_numbers<[1], [0], [0], [1], [0, 0, 1, 1], [], []>} : vector<16x128xf32>, vector<128x256xf32>, vector<16x256xf32> -> vector<16x256xf32>
    %7 = arith.addf %3, %6 : vector<16x256xf32>
    %c0_6 = arith.constant 0 : index
    %c0_7 = arith.constant 0 : index
    %8 = vector.load %arg6[%c0_6, %c0_7] : memref<16x256xf32, #tpu.memory_space<vmem>>, vector<16x256xf32>
    tpu.vector_store %arg6[%c0_6, %c0_7], %7 {strides = array<i32>} : memref<16x256xf32, #tpu.memory_space<vmem>>, vector<16x256xf32>,
    %c0_i32_8 = arith.constant 0 : i32
    %9 = arith.cmpi eq, %arg1, %c0_i32_8 : i32
    %10 = arith.extui %9 : i1 to i32
    %c0_i32_9 = arith.constant 0 : i32
    %11 = arith.cmpi ne, %10, %c0_i32_9 : i32
    scf.if %11 {
      %c0_10 = arith.constant 0 : index
      %c0_11 = arith.constant 0 : index
      %12 = vector.load %arg6[%c0_10, %c0_11] : memref<16x256xf32, #tpu.memory_space<vmem>>, vector<16x256xf32>
      %c0_12 = arith.constant 0 : index
      %c0_13 = arith.constant 0 : index
      %13 = vector.load %arg4[%c0_12, %c0_13] : memref<1x256xf32, #tpu.memory_space<vmem>>, vector<1x256xf32>
      %14 = vector.broadcast %13 : vector<1x256xf32> to vector<16x256xf32>
      %15 = arith.addf %12, %14 : vector<16x256xf32>
      %cst_14 = arith.constant dense<0xFF800000> : vector<16xf32>
      %16 = vector.multi_reduction <maximumf>, %15, %cst_14 [1] : vector<16x256xf32> to vector<16xf32>
      %17 = vector.shape_cast %16 : vector<16xf32> to vector<16x1xf32>
      %18 = vector.broadcast %17 : vector<16x1xf32> to vector<16x256xf32>
      %19 = arith.subf %15, %18 : vector<16x256xf32>
      %20 = math.exp %19 : vector<16x256xf32>
      %cst_15 = arith.constant dense<0.000000e+00> : vector<16xf32>
      %21 = vector.multi_reduction <add>, %20, %cst_15 [1] : vector<16x256xf32> to vector<16xf32>
      %22 = vector.shape_cast %21 : vector<16xf32> to vector<16x1xf32>
      %23 = vector.broadcast %22 : vector<16x1xf32> to vector<16x256xf32>
      %24 = arith.divf %20, %23 : vector<16x256xf32>
      %c0_16 = arith.constant 0 : index
      %c0_17 = arith.constant 0 : index
      %25 = vector.load %arg5[%c0_16, %c0_17] : memref<16x256xf32, #tpu.memory_space<vmem>>, vector<16x256xf32>
      tpu.vector_store %arg5[%c0_16, %c0_17], %24 {strides = array<i32>} : memref<16x256xf32, #tpu.memory_space<vmem>>, vector<16x256xf32>,
    } else {
    }
    return
  }
  func.func @transform_0(%arg0: i32, %arg1: i32) -> (i32, i32) {
    %c0_i32 = arith.constant 0 : i32
    return %arg0, %arg1 : i32, i32
  }
  func.func @transform_1(%arg0: i32, %arg1: i32) -> (i32, i32) {
    %c0_i32 = arith.constant 0 : i32
    %c0_i32_0 = arith.constant 0 : i32
    return %arg1, %c0_i32 : i32, i32
  }
  func.func @transform_2(%arg0: i32, %arg1: i32) -> (i32, i32) {
    %c0_i32 = arith.constant 0 : i32
    %c0_i32_0 = arith.constant 0 : i32
    %c0_i32_1 = arith.constant 0 : i32
    return %c0_i32, %c0_i32_0 : i32, i32
  }
  func.func @transform_3(%arg0: i32, %arg1: i32) -> (i32, i32) {
    %c0_i32 = arith.constant 0 : i32
    %c0_i32_0 = arith.constant 0 : i32
    return %arg0, %c0_i32 : i32, i32
  }
}

</mosaic_0001>

<bundles_post_ra>
// kernel: tpu_custom_call.1
= control target key start
LH: loop header
LB: loop body
LE: loop exit
PB: predicated region body
PF: predicated region fallthrough
CT: control target
= control target key end

     0   :  { %8 = vsyncpa [#allocation4], 0  ;;  %s457_s0 = inlined_call_operand.hbm [shape: f32[16,128], index: 0, kind: input, shape index: {}]   ;;  %s458_s1 = inlined_call_operand.hbm [shape: f32[128,256], index: 1, kind: input, shape index: {}]   ;;  %s459_s2 = inlined_call_operand.hbm [shape: f32[1,256], index: 2, kind: input, shape index: {}]   ;;  %s460_s3 = inlined_call_operand.hbm [shape: f32[16,256], index: 3, kind: output, shape index: {}]  }
   0x1   :  { %9 = vsyncpa [#allocation7], 0  ;;  %s28_s14 = sshll.u32 %s458_s1, 4  ;;  %s29_s14 = int_to_ptr.hbm [resolvable:$true] %s28_s14 }
   0x2   :  { %10 = vsyncpa [#allocation5], 0  ;;  %s411_s15 = smov [#allocation6]   ;;  %s15_s19 = sshll.u32 %s457_s0, 4  ;;  %s16_s19 = int_to_ptr.hbm [resolvable:$true] %s15_s19 }
   0x3   :  { %s30_s16 = sshll.u32 %s411_s15, 4  ;;  %s412_s20 = smov 256   ;;  %s31_s16 = int_to_ptr.vmem [resolvable:$true] %s30_s16 }
   0x4   :  { %s413_s21 = smov 16   ;;  %s414_s22 = smov [#allocation3]  }
   0x5   :  { %36 = dma.hbm_to_vmem [thread:$0]  %s29_s14, 4096, %s31_s16, [#allocation7], %s412_s20, %s412_s20, %s413_s21  }
   0x6   :  { %s17_s23 = sshll.u32 %s414_s22, 4  ;;  %s415_s1 = smov 128   ;;  %s18_s23 = int_to_ptr.vmem [resolvable:$true] %s17_s23 }
   0x7   :  { %s416_s24 = smov 8   ;;  %s42_s27 = sshll.u32 %s459_s2, 4  ;;  %s43_s27 = int_to_ptr.hbm [resolvable:$true] %s42_s27 }
   0x8   :  { %23 = dma.hbm_to_vmem [thread:$0]  %s16_s19, 256, %s18_s23, [#allocation4], %s415_s1, %s415_s1, %s416_s24  }
   0x9   :  { %s417_s28 = smov [#allocation8]  }
   0xa   :  { %s44_s0 = sshll.u32 %s417_s28, 4  ;;  %s45_s0 = int_to_ptr.vmem [resolvable:$true] %s44_s0 }
   0xb   :  { %47 = dma.hbm_to_vmem [thread:$0]  %s43_s27, 32, %s45_s0, [#allocation7]  }
   0xc   :  { %405 = dma.done.wait [#allocation4], 256  }
   0xd   :  { %406 = vsyncadd [#allocation4], 4294967040 }
   0xe   :  { %407 = dma.done.wait [#allocation7], 4128  }
   0xf   :  { %408 = vsyncadd [#allocation7], 4294963168  ;;  %v104_v0 = vld [vmem:[#allocation6 + $0xf0] sm:$0xff]  ;;  %v105_v1 = vld [vmem:[#allocation6 + $0xf8] sm:$0xff]  ;;  %s418_s2 = smov [#allocation9]   ;;  %s243_s5 = sshll.u32 %s460_s3, 4  ;;  %s244_s5 = int_to_ptr.hbm [resolvable:$true] %s243_s5 }
  0x10   :  { %v102_v2 = vld [vmem:[#allocation6 + $0xe0] sm:$0xff]  ;;  %106 = vmatpush.msra.mxu0 %v104_v0  ;;  %129 = vmatpush.msra.mxu1 %v105_v1  ;;  %v103_v3 = vld [vmem:[#allocation6 + $0xe8] sm:$0xff]  ;;  %v100_v4 = vld [vmem:[#allocation6 + $0xd0] sm:$0xff]  ;;  %s241_s29 = sshll.u32 %s418_s2, 4  ;;  %s242_s29 = int_to_ptr.vmem [resolvable:$true] %s241_s29 }
  0x11   :  { %257 = vmatpush.msra.mxu2 %v104_v0  ;;  %273 = vmatpush.msra.mxu3 %v105_v1  ;;  %v101_v5 = vld [vmem:[#allocation6 + $0xd8] sm:$0xff]  ;;  %v98_v6 = vld [vmem:[#allocation6 + $0xc0] sm:$0xff]  ;;  %v99_v7 = vld [vmem:[#allocation6 + $0xc8] sm:$0xff] }
  0x12   :  { %107 = vmatpush.msra.mxu0 %v102_v2  ;;  %130 = vmatpush.msra.mxu1 %v103_v3  ;;  %v96_v8 = vld [vmem:[#allocation6 + $0xb0] sm:$0xff]  ;;  %v97_v9 = vld [vmem:[#allocation6 + $0xb8] sm:$0xff]  ;;  %v94_v10 = vld [vmem:[#allocation6 + $0xa0] sm:$0xff] }
  0x13   :  { %258 = vmatpush.msra.mxu2 %v102_v2  ;;  %274 = vmatpush.msra.mxu3 %v103_v3  ;;  %v95_v11 = vld [vmem:[#allocation6 + $0xa8] sm:$0xff]  ;;  %v92_v12 = vld [vmem:[#allocation6 + $0x90] sm:$0xff]  ;;  %v93_v13 = vld [vmem:[#allocation6 + $0x98] sm:$0xff] }
  0x14   :  { %108 = vmatpush.msra.mxu0 %v100_v4  ;;  %131 = vmatpush.msra.mxu1 %v101_v5  ;;  %v90_v14 = vld [vmem:[#allocation6 + $0x80] sm:$0xff]  ;;  %v91_v15 = vld [vmem:[#allocation6 + $0x88] sm:$0xff]  ;;  %v88_v16 = vld [vmem:[#allocation6 + $0x70] sm:$0xff] }
  0x15   :  { %259 = vmatpush.msra.mxu2 %v100_v4  ;;  %275 = vmatpush.msra.mxu3 %v101_v5  ;;  %v89_v17 = vld [vmem:[#allocation6 + $0x78] sm:$0xff]  ;;  %v86_v18 = vld [vmem:[#allocation6 + $0x60] sm:$0xff]  ;;  %v87_v19 = vld [vmem:[#allocation6 + $0x68] sm:$0xff] }
  0x16   :  { %109 = vmatpush.msra.mxu0 %v98_v6  ;;  %132 = vmatpush.msra.mxu1 %v99_v7  ;;  %v84_v20 = vld [vmem:[#allocation6 + $0x50] sm:$0xff]  ;;  %v85_v21 = vld [vmem:[#allocation6 + $0x58] sm:$0xff]  ;;  %v82_v22 = vld [vmem:[#allocation6 + $0x40] sm:$0xff] }
  0x17   :  { %260 = vmatpush.msra.mxu2 %v98_v6  ;;  %276 = vmatpush.msra.mxu3 %v99_v7  ;;  %v83_v23 = vld [vmem:[#allocation6 + $0x48] sm:$0xff]  ;;  %v80_v24 = vld [vmem:[#allocation6 + $0x30] sm:$0xff]  ;;  %v81_v25 = vld [vmem:[#allocation6 + $0x38] sm:$0xff] }
  0x18   :  { %110 = vmatpush.msra.mxu0 %v96_v8  ;;  %133 = vmatpush.msra.mxu1 %v97_v9  ;;  %v78_v26 = vld [vmem:[#allocation6 + $0x20] sm:$0xff]  ;;  %v79_v27 = vld [vmem:[#allocation6 + $0x28] sm:$0xff]  ;;  %v76_v28 = vld [vmem:[#allocation6 + $0x10] sm:$0xff] }
  0x19   :  { %261 = vmatpush.msra.mxu2 %v96_v8  ;;  %277 = vmatpush.msra.mxu3 %v97_v9  ;;  %v77_v29 = vld [vmem:[#allocation6 + $0x18] sm:$0xff]  ;;  %v74_v30 = vld [vmem:[#allocation6] sm:$0xff]  ;;  %v75_v31 = vld [vmem:[#allocation6 + $0x8] sm:$0xff] }
  0x1a   :  { %111 = vmatpush.msra.mxu0 %v94_v10  ;;  %134 = vmatpush.msra.mxu1 %v95_v11  ;;  %v72_v32 = vld [vmem:[#allocation3] sm:$0xff]  ;;  %v73_v33 = vld [vmem:[#allocation3 + $0x8] sm:$0xff]  ;;  %v167_v34 = vld [vmem:[#allocation8] sm:$0x3] }
  0x1b   :  { %262 = vmatpush.msra.mxu2 %v94_v10  ;;  %278 = vmatpush.msra.mxu3 %v95_v11  ;;  %v169_v35 = vperm.slane %v167_v34, 0  ;;  %v170_v36 = vperm.slane %v167_v34, 1 }
  0x1c   :  { %112 = vmatpush.msra.mxu0 %v92_v12  ;;  %135 = vmatpush.msra.mxu1 %v93_v13 }
  0x1d   :  { %263 = vmatpush.msra.mxu2 %v92_v12  ;;  %279 = vmatpush.msra.mxu3 %v93_v13 }
  0x1e   :  { %113 = vmatpush.msra.mxu0 %v90_v14  ;;  %136 = vmatpush.msra.mxu1 %v91_v15 }
  0x1f   :  { %264 = vmatpush.msra.mxu2 %v90_v14  ;;  %280 = vmatpush.msra.mxu3 %v91_v15 }
  0x20   :  { %114 = vmatpush.msra.mxu0 %v88_v16  ;;  %137 = vmatpush.msra.mxu1 %v89_v17 }
  0x21   :  { %265 = vmatpush.msra.mxu2 %v88_v16  ;;  %281 = vmatpush.msra.mxu3 %v89_v17 }
  0x22   :  { %115 = vmatpush.msra.mxu0 %v86_v18  ;;  %138 = vmatpush.msra.mxu1 %v87_v19 }
  0x23   :  { %266 = vmatpush.msra.mxu2 %v86_v18  ;;  %282 = vmatpush.msra.mxu3 %v87_v19 }
  0x24   :  { %116 = vmatpush.msra.mxu0 %v84_v20  ;;  %139 = vmatpush.msra.mxu1 %v85_v21 }
  0x25   :  { %267 = vmatpush.msra.mxu2 %v84_v20  ;;  %283 = vmatpush.msra.mxu3 %v85_v21 }
  0x26   :  { %117 = vmatpush.msra.mxu0 %v82_v22  ;;  %140 = vmatpush.msra.mxu1 %v83_v23 }
  0x27   :  { %268 = vmatpush.msra.mxu2 %v82_v22  ;;  %284 = vmatpush.msra.mxu3 %v83_v23 }
  0x28   :  { %118 = vmatpush.msra.mxu0 %v80_v24  ;;  %141 = vmatpush.msra.mxu1 %v81_v25 }
  0x29   :  { %269 = vmatpush.msra.mxu2 %v80_v24  ;;  %285 = vmatpush.msra.mxu3 %v81_v25 }
  0x2a   :  { %119 = vmatpush.msra.mxu0 %v78_v26  ;;  %142 = vmatpush.msra.mxu1 %v79_v27 }
  0x2b   :  { %270 = vmatpush.msra.mxu2 %v78_v26  ;;  %286 = vmatpush.msra.mxu3 %v79_v27 }
  0x2c   :  { %120 = vmatpush.msra.mxu0 %v76_v28  ;;  %143 = vmatpush.msra.mxu1 %v77_v29 }
  0x2d   :  { %271 = vmatpush.msra.mxu2 %v76_v28  ;;  %287 = vmatpush.msra.mxu3 %v77_v29 }
  0x2e   :  { %121 = vmatpush.msra.mxu0 %v74_v30  ;;  %144 = vmatpush.msra.mxu1 %v75_v31 }
  0x2f   :  { %122 = vmatmul.f32.vlgmr.msra.gmra.mxu0 %v72_v32  ;;  %145 = vmatmul.f32.vlgmr.msra.gmra.mxu1 %v72_v32 }
  0x30   :  { %272 = vmatpush.msra.mxu2 %v74_v30  ;;  %288 = vmatpush.msra.mxu3 %v75_v31 }
  0x31   :  { %125 = vmatmul.f32.vlgmr.msra.gmra.mxu2 %v73_v33  ;;  %148 = vmatmul.f32.vlgmr.msra.gmra.mxu3 %v73_v33 }
  0xac   :  { %v123_v37 = vpop.f32.mrf.mxu0  ;;  %v146_v38 = vpop.f32.mrf.mxu1 }
  0xad   :  { %v173_v39 = vadd.f32 %v169_v35, %v123_v37  ;;  %v174_v40 = vadd.f32 %v170_v36, %v146_v38 }
  0xaf   :  { %v177_v41 = vmax.f32 %v173_v39, %v174_v40 }
  0xb1   :  { %178 = vmax.xlane.f32.xlu0 %v177_v41 }
  0xb4   :  { %v126_v42 = vpop.f32.mrf.mxu2  ;;  %v149_v43 = vpop.f32.mrf.mxu3 }
  0xb5   :  { %v175_v44 = vadd.f32 %v169_v35, %v126_v42  ;;  %v176_v45 = vadd.f32 %v170_v36, %v149_v43 }
  0xb7   :  { %v180_v46 = vmax.f32 %v175_v44, %v176_v45 }
  0xb9   :  { %181 = vmax.xlane.f32.xlu0 %v180_v46 }
 0x124   :  { %v179_v47 = vpop.xlane.xlu0 %178 }
 0x125   :  { %v183_v48 = vsub.f32 %v173_v39, %v179_v47  ;;  %v184_v49 = vsub.f32 %v174_v40, %v179_v47 }
 0x127   :  { %v187_v50 = vmul.f32 1.442695, %v183_v48  ;;  %v189_v51 = vmul.f32 1.442695, %v184_v49 }
 0x129   :  { %297 = vpow2.f32 %v187_v50 }
 0x12a   :  { %299 = vpow2.f32 %v189_v51 }
 0x12c   :  { %v182_v52 = vpop.xlane.xlu0 %181 }
 0x12d   :  { %v185_v53 = vsub.f32 %v175_v44, %v182_v52  ;;  %v186_v54 = vsub.f32 %v176_v45, %v182_v52 }
 0x12f   :  { %v298_v55 = vpop.eup %297  ;;  %v191_v56 = vmul.f32 1.442695, %v185_v53  ;;  %v193_v57 = vmul.f32 1.442695, %v186_v54 }
 0x130   :  { %v300_v58 = vpop.eup %299 }
 0x131   :  { %301 = vpow2.f32 %v191_v56  ;;  %v195_v59 = vadd.f32 %v300_v58, %v298_v55 }
 0x132   :  { %303 = vpow2.f32 %v193_v57 }
 0x133   :  { %196 = vadd.xlane.f32.xlu1 %v195_v59 }
 0x137   :  { %v302_v60 = vpop.eup %301 }
 0x138   :  { %v304_v61 = vpop.eup %303 }
 0x139   :  { %v198_v62 = vadd.f32 %v304_v61, %v302_v60 }
 0x13b   :  { %199 = vadd.xlane.f32.xlu1 %v198_v62 }
 0x1a6   :  { %v197_v63 = vpop.xlane.xlu1 %196 }
 0x1a7   :  { %305 = vrcp.f32 %v197_v63  ;;  %v212_v4 = vand.u32 2147483648, %v197_v63  ;;  %v210_v6 = vand.u32 2147483647, %v197_v63  ;;  %vm206_vm1 = vweird.f32 %v197_v63 }
 0x1a9   :  { %v213_v9 = vor.u32 1.1754944e-38, %v212_v4  ;;  %vm211_vm3 = vcmp.eq.f32.partialorder %v210_v6, 8.507059e+37 }
 0x1ad   :  { %v306_v0 = vpop.eup %305 }
 0x1ae   :  { %v202_v1 = vmul.f32 %v306_v0, %v197_v63  ;;  %v200_v2 = vpop.xlane.xlu1 %199  ;;  %vm207_vm0 = vweird.f32 %v306_v0 }
 0x1af   :  { %307 = vrcp.f32 %v200_v2  ;;  %vm208_vm2 = vmor %vm206_vm1, %vm207_vm0  ;;  %v228_v16 = vand.u32 2147483648, %v200_v2  ;;  %v226_v18 = vand.u32 2147483647, %v200_v2  ;;  %vm222_vm5 = vweird.f32 %v200_v2 }
 0x1b0   :  { %v203_v3 = vsub.f32 1.0, %v202_v1 }
 0x1b1   :  { %v229_v20 = vor.u32 1.1754944e-38, %v228_v16  ;;  %vm227_vm7 = vcmp.eq.f32.partialorder %v226_v18, 8.507059e+37 }
 0x1b2   :  { %v204_v5 = vmul.f32 %v306_v0, %v203_v3 }
 0x1b4   :  { %v205_v7 = vadd.f32 %v306_v0, %v204_v5 }
 0x1b5   :  { %v308_v8 = vpop.eup %307 }
 0x1b6   :  { %v209_v10 = vsel %vm208_vm2, %v306_v0, %v205_v7  ;;  %v218_v11 = vmul.f32 %v308_v8, %v200_v2  ;;  %vm223_vm4 = vweird.f32 %v308_v8 }
 0x1b7   :  { %v214_v12 = vsel %vm211_vm3, %v213_v9, %v209_v10  ;;  %vm224_vm6 = vmor %vm222_vm5, %vm223_vm4 }
 0x1b8   :  { %v215_v13 = vmul.f32 %v298_v55, %v214_v12  ;;  %v216_v14 = vmul.f32 %v300_v58, %v214_v12  ;;  %v219_v15 = vsub.f32 1.0, %v218_v11 }
 0x1ba   :  { %233 = vst [vmem:[#allocation9] sm:$0xff] %v215_v13  ;;  %v220_v17 = vmul.f32 %v308_v8, %v219_v15 }
 0x1bb   :  { %234 = vst [vmem:[#allocation9 + $0x8] sm:$0xff] %v216_v14 }
 0x1bc   :  { %v221_v19 = vadd.f32 %v308_v8, %v220_v17 }
 0x1be   :  { %v225_v21 = vsel %vm224_vm6, %v308_v8, %v221_v19 }
 0x1bf   :  { %v230_v22 = vsel %vm227_vm7, %v229_v20, %v225_v21 }
 0x1c0   :  { %v231_v23 = vmul.f32 %v302_v60, %v230_v22  ;;  %v232_v24 = vmul.f32 %v304_v61, %v230_v22 }
 0x1c2   :  { %235 = vst [vmem:[#allocation9 + $0x10] sm:$0xff] %v231_v23 }
 0x1c3   :  { %236 = vst [vmem:[#allocation9 + $0x18] sm:$0xff] %v232_v24 }
 0x1c4   :  { %249 = dma.vmem_to_hbm [thread:$0]  %s242_s29, 512, %s244_s5, [#allocation5], %s412_s20, %s412_s20, %s413_s21  }
 0x1c5   :  { %409 = dma.done.wait [#allocation5], 512  }
 0x1c6   :  { %410 = vsyncadd [#allocation5], 4294966784 }
 0x1c7   :  { %254 = vsyncpa [#allocation4], 1 }
 0x1c8   :  { %255 = vsyncpa [#allocation7], 1 }
 0x1c9   :  { %256 = vsyncpa [#allocation5], 1 }

</bundles_post_ra>
